<compile_context>
chip_gen: v7x
topology: tpu7x:2x2x1
jax: 0.10.0
libtpu: 0.0.40
codegen_flags: <defaults>
</compile_context>

<pallas_src>
import numpy as np
import jax
import jax.numpy as jnp
from jax import lax
from jax.experimental import pallas as pl
from jax.experimental.pallas import tpu as pltpu

NEG_FILL = -1000000000.0


def generator_kernel(x_ref, slots_ref, mask_ans_ref, sshs_ref,
                     wq_ref, b2_ref, fc_ref, mask_cv_ref, mask_cs_ref,
                     se_ref, sv_ref):
    Bt, L, H = x_ref.shape
    S = sshs_ref.shape[1]
    inv_sqrt_h = 1.0 / (float(H) ** 0.5)

    x = x_ref[...]                        # [Bt, L, H]   (matmul dtype)
    slots = slots_ref[...]                # [Bt*S, H]    (matmul dtype)
    mask_ans = mask_ans_ref[...]          # [Bt, 1, L]   additive 0 / NEG_FILL (f32)

    # ---- fused Q projection: one MXU dot over the slot rows (M = Bt*S) ----
    #   q2[:, :H]  = slots @ W_start^T ;  q2[:, H:] = slots @ W_end^T
    q2 = lax.dot_general(
        slots, wq_ref[...],
        dimension_numbers=(((1,), (1,)), ((), ())),
        preferred_element_type=jnp.float32)                       # [Bt*S, 2H]
    q_start = q2[:, :H].reshape(Bt, S, H)
    q_end = q2[:, H:].reshape(Bt, S, H)
    q_cat = jnp.concatenate([q_start, q_end], axis=1).astype(x.dtype)   # [Bt, 2S, H]

    # bias term slots . b  (VPU multiply + lane reduce; keeps the MXU operand lane-clean)
    slots3 = slots.reshape(Bt, S, H).astype(jnp.float32)
    b2 = b2_ref[...].astype(jnp.float32)                          # [2, H]
    bias_s = jnp.sum(slots3 * b2[0], axis=-1, keepdims=True)      # [Bt, S, 1]
    bias_e = jnp.sum(slots3 * b2[1], axis=-1, keepdims=True)      # [Bt, S, 1]
    bias_cat = jnp.concatenate([bias_s, bias_e], axis=1)          # [Bt, 2S, 1]

    # ---- fused start/end SAM: ONE batched score matmul (M = 2S rows / batch) ----
    score = jnp.einsum('bsh,blh->bsl', q_cat, x,
                       preferred_element_type=jnp.float32)        # [Bt, 2S, L]
    score = (score + bias_cat) * inv_sqrt_h + mask_ans            # additive mask
    score = score - jnp.max(score, axis=-1, keepdims=True)
    e = jnp.exp(score)
    p = e * pl.reciprocal(jnp.sum(e, axis=-1, keepdims=True), approx=True)
    se_ref[...] = p.astype(se_ref.dtype)                          # [Bt, 2S, L]

    # ---- per-slot classification head on the MXU (batched over S, contract H) ----
    sshs_t = jnp.transpose(sshs_ref[...], (1, 0, 2))              # [S, Bt, H]
    sv = jnp.einsum('sbh,shv->sbv', sshs_t, fc_ref[...],
                    preferred_element_type=jnp.float32)           # [S, Bt, V]
    sv = sv + mask_cv_ref[...]                                    # [S, 1, V] additive mask
    sv = sv - jnp.max(sv, axis=-1, keepdims=True)
    ev = jnp.exp(sv)
    pv = ev * pl.reciprocal(jnp.sum(ev, axis=-1, keepdims=True), approx=True)
    pv = pv * mask_cs_ref[...]                                    # [S, 1, 1] 0/1 multiplier
    sv_ref[...] = jnp.transpose(pv, (1, 0, 2)).astype(sv_ref.dtype)   # [Bt, S, V]


def _default_block_b(B, S):
    """Largest divisor of B giving >=2 grid steps, preferring block_b*S % 8 == 0."""
    candidates = [d for d in range(B // 2, 0, -1) if B % d == 0]
    for d in candidates:
        if (d * S) % 8 == 0:
            return d
    # No sublane-aligned multi-step split exists; fall back to the full batch
    # (full-extent blocks are always layout-legal).
    return B


def generator_forward(x, slots, mask_answer, sshs,
                      w_start, b_start, w_end, b_end,
                      fc_each_slot, mask_cate_value, mask_cate_slot,
                      *, block_b=None, matmul_dtype=None, vmem_limit_bytes=None):
    """Pallas forward of Generator.forward (dropout = inference identity).

    Weights are stored [in_features, out_features] (y = x @ W + b).

    block_b:  batch rows per grid step.  Default: >=2 steps (v7x megacore + DMA
              overlap).  On v7x re-derive against 64 MiB VMEM (roughly half the
              block that fits v6e's 128 MiB); on v6e pick the largest block that
              keeps >=4 steps and raise vmem_limit_bytes above the 32 MiB default.
    matmul_dtype: e.g. jnp.bfloat16 on v6e/v7x to halve x DMA traffic and double
              MXU rate; softmax math stays f32.
    """
    B, L, H = x.shape
    S = slots.shape[1]
    V = fc_each_slot.shape[-1]

    if block_b is None:
        block_b = _default_block_b(B, S)
    assert B % block_b == 0, "block_b must divide the batch size"
    bt = block_b
    grid = (B // bt,)

    # Fused, lane-clean projection weight: rows = [W_start ; W_end], contracted axis = out.
    wq = jnp.concatenate([w_start, w_end], axis=0)                # [2H, H]
    b2 = jnp.stack([b_start, b_end], axis=0)                      # [2, H]

    slots_flat = slots.reshape(B * S, H)

    # Masks as additive f32 bias / 0-1 multiplier (no compares or selects in-kernel).
    mask_ans_bias = jnp.where(mask_answer != 0, 0.0, NEG_FILL).astype(jnp.float32)
    mask_ans_bias = mask_ans_bias.reshape(B, 1, L)
    mask_cv_bias = jnp.where(mask_cate_value != 0, 0.0, NEG_FILL).astype(jnp.float32)
    mask_cv_bias = mask_cv_bias.reshape(S, 1, V)
    mask_cs_f = (mask_cate_slot != 0).astype(jnp.float32).reshape(S, 1, 1)

    x_in, slots_in, sshs_in, wq_in, fc_in = x, slots_flat, sshs, wq, fc_each_slot
    if matmul_dtype is not None:          # e.g. jnp.bfloat16 on v6e / v7x
        x_in = x_in.astype(matmul_dtype)
        slots_in = slots_in.astype(matmul_dtype)
        sshs_in = sshs_in.astype(matmul_dtype)
        wq_in = wq_in.astype(matmul_dtype)
        fc_in = fc_in.astype(matmul_dtype)

    grid_spec = pltpu.PrefetchScalarGridSpec(
        num_scalar_prefetch=0,
        grid=grid,
        in_specs=[
            pl.BlockSpec((bt, L, H), lambda b: (b, 0, 0)),        # x
            pl.BlockSpec((bt * S, H), lambda b: (b, 0)),          # slots (flattened rows)
            pl.BlockSpec((bt, 1, L), lambda b: (b, 0, 0)),        # mask_answerArea bias
            pl.BlockSpec((bt, S, H), lambda b: (b, 0, 0)),        # sentencesSlotsHiddenStates
            pl.BlockSpec((2 * H, H), lambda b: (0, 0)),           # fused W_start|W_end
            pl.BlockSpec((2, H), lambda b: (0, 0)),               # [b_start ; b_end]
            pl.BlockSpec((S, H, V), lambda b: (0, 0, 0)),         # fcForEachSlot
            pl.BlockSpec((S, 1, V), lambda b: (0, 0, 0)),         # mask_cate_value bias
            pl.BlockSpec((S, 1, 1), lambda b: (0, 0, 0)),         # mask_cateSlot multiplier
        ],
        out_specs=[
            pl.BlockSpec((bt, 2 * S, L), lambda b: (b, 0, 0)),    # start|end probs (fused)
            pl.BlockSpec((bt, S, V), lambda b: (b, 0, 0)),        # slotValueProb
        ],
    )

    out_shapes = (
        jax.ShapeDtypeStruct((B, 2 * S, L), jnp.float32),
        jax.ShapeDtypeStruct((B, S, V), jnp.float32),
    )

    itemsize = 2 if matmul_dtype == jnp.bfloat16 else 4
    cost = pl.CostEstimate(
        flops=2 * B * S * (2 * H) * H + 2 * B * (2 * S) * L * H + 2 * B * S * H * V,
        transcendentals=B * 2 * S * L + B * S * V,
        bytes_accessed=itemsize * (x.size + slots.size + sshs.size
                                   + wq.size + fc_each_slot.size)
                       + 4 * (B * 2 * S * L + B * S * V + B * L + S * V + S),
    )

    se, sv = pl.pallas_call(
        generator_kernel,
        out_shape=out_shapes,
        grid_spec=grid_spec,
        compiler_params=pltpu.CompilerParams(
            dimension_semantics=("parallel",),
            vmem_limit_bytes=vmem_limit_bytes),
        cost_estimate=cost,
    )(x_in, slots_in, mask_ans_bias, sshs_in, wq_in, b2, fc_in, mask_cv_bias, mask_cs_f)

    start_p = se[:, :S, :]
    end_p = se[:, S:, :]
    return start_p, end_p, sv


def reference_forward(x, slots, mask_answer, sshs,
                      w_start, b_start, w_end, b_end,
                      fc_each_slot, mask_cate_value, mask_cate_slot):
    H = x.shape[-1]

    def sam(p):
        score = jnp.einsum('blh,bsh->bsl', p, slots) / (H ** 0.5)
        score = jnp.where(mask_answer[:, None, :] == 0, NEG_FILL, score)
        return jax.nn.softmax(score, axis=-1)

    xs = x @ w_start + b_start
    xe = x @ w_end + b_end
    start_p = sam(xs)
    end_p = sam(xe)
    sv = jnp.einsum('bsh,shv->bsv', sshs, fc_each_slot)
    sv = jnp.where(mask_cate_value[None] == 0, NEG_FILL, sv)
    sv = jax.nn.softmax(sv, axis=-1)
    sv = jnp.where(mask_cate_slot[None, :, None] == 0, 0.0, sv)
    return start_p, end_p, sv


if __name__ == "__main__":
    # batch, seqLen, hidden_size, slotTypeNum, maxSlotValue
    B, L, H, S, V = 4, 16, 32, 4, 8

    key = jax.random.PRNGKey(0)
    ks = jax.random.split(key, 10)

    x = jax.random.normal(ks[0], (B, L, H), dtype=jnp.float32)
    slots = jax.random.normal(ks[1], (B, S, H), dtype=jnp.float32)
    sshs = jax.random.normal(ks[2], (B, S, H), dtype=jnp.float32)

    # mask_answerArea: 1 where attention allowed (at least one valid position per row)
    mask_answer = (jax.random.uniform(ks[3], (B, L)) > 0.3).astype(jnp.float32)
    mask_answer = mask_answer.at[:, 0].set(1.0)

    # Linear weights stored as [in, out]
    w_start = jax.random.normal(ks[4], (H, H), dtype=jnp.float32) * 0.1
    b_start = jax.random.normal(ks[5], (H,), dtype=jnp.float32) * 0.1
    w_end = jax.random.normal(ks[6], (H, H), dtype=jnp.float32) * 0.1
    b_end = jax.random.normal(ks[7], (H,), dtype=jnp.float32) * 0.1
    fc_each_slot = jax.random.normal(ks[8], (S, H, V), dtype=jnp.float32) * 0.1

    mask_cate_value = (jax.random.uniform(ks[9], (S, V)) > 0.3).astype(jnp.float32)
    mask_cate_value = mask_cate_value.at[:, 0].set(1.0)
    mask_cate_slot = jnp.array([1.0, 0.0, 1.0, 1.0], dtype=jnp.float32)

    out = generator_forward(x, slots, mask_answer, sshs,
                            w_start, b_start, w_end, b_end,
                            fc_each_slot, mask_cate_value, mask_cate_slot)
    out = jax.block_until_ready(out)

    ref = reference_forward(x, slots, mask_answer, sshs,
                            w_start, b_start, w_end, b_end,
                            fc_each_slot, mask_cate_value, mask_cate_slot)

    # Tolerance accounts for the EUP approximate reciprocal in the softmax denominators.
    for o, r in zip(out, ref):
        np.testing.assert_allclose(np.asarray(o), np.asarray(r), rtol=5e-3, atol=1e-3)

    print("KERNEL_OK")
</pallas_src>

<mosaic_0001>
module attributes {stable_mosaic.version = 11 : i64} {
  func.func @generator_kernel(%arg0: i32, %arg1: memref<2x16x32xf32, #tpu.memory_space<vmem>>, %arg2: memref<8x32xf32, #tpu.memory_space<vmem>>, %arg3: memref<2x1x16xf32, #tpu.memory_space<vmem>>, %arg4: memref<2x4x32xf32, #tpu.memory_space<vmem>>, %arg5: memref<64x32xf32, #tpu.memory_space<vmem>>, %arg6: memref<2x32xf32, #tpu.memory_space<vmem>>, %arg7: memref<4x32x8xf32, #tpu.memory_space<vmem>>, %arg8: memref<4x1x8xf32, #tpu.memory_space<vmem>>, %arg9: memref<4x1x1xf32, #tpu.memory_space<vmem>>, %arg10: memref<2x8x16xf32, #tpu.memory_space<vmem>>, %arg11: memref<2x4x8xf32, #tpu.memory_space<vmem>>) attributes {dimension_semantics = [#tpu.dimension_semantics<parallel>], iteration_bounds = array<i64: 2>, scalar_prefetch = 0 : i64, scratch_operands = 0 : i64, tpu.core_type = #tpu.core_type<tc>, window_params = [{transform_indices = @transform_0, window_bounds = array<i64: 2, 16, 32>}, {transform_indices = @transform_1, window_bounds = array<i64: 8, 32>}, {transform_indices = @transform_2, window_bounds = array<i64: 2, 1, 16>}, {transform_indices = @transform_3, window_bounds = array<i64: 2, 4, 32>}, {pipeline_mode = #tpu.pipeline_mode<synchronous>, transform_indices = @transform_4, window_bounds = array<i64: 64, 32>}, {pipeline_mode = #tpu.pipeline_mode<synchronous>, transform_indices = @transform_5, window_bounds = array<i64: 2, 32>}, {pipeline_mode = #tpu.pipeline_mode<synchronous>, transform_indices = @transform_6, window_bounds = array<i64: 4, 32, 8>}, {pipeline_mode = #tpu.pipeline_mode<synchronous>, transform_indices = @transform_7, window_bounds = array<i64: 4, 1, 8>}, {pipeline_mode = #tpu.pipeline_mode<synchronous>, transform_indices = @transform_8, window_bounds = array<i64: 4, 1, 1>}, {transform_indices = @transform_9, window_bounds = array<i64: 2, 8, 16>}, {transform_indices = @transform_10, window_bounds = array<i64: 2, 4, 8>}]} {
    %c0 = arith.constant 0 : index
    %c0_0 = arith.constant 0 : index
    %c0_1 = arith.constant 0 : index
    %0 = vector.load %arg1[%c0, %c0_0, %c0_1] : memref<2x16x32xf32, #tpu.memory_space<vmem>>, vector<2x16x32xf32>
    %c0_2 = arith.constant 0 : index
    %c0_3 = arith.constant 0 : index
    %1 = vector.load %arg2[%c0_2, %c0_3] : memref<8x32xf32, #tpu.memory_space<vmem>>, vector<8x32xf32>
    %c0_4 = arith.constant 0 : index
    %c0_5 = arith.constant 0 : index
    %c0_6 = arith.constant 0 : index
    %2 = vector.load %arg3[%c0_4, %c0_5, %c0_6] : memref<2x1x16xf32, #tpu.memory_space<vmem>>, vector<2x1x16xf32>
    %c0_7 = arith.constant 0 : index
    %c0_8 = arith.constant 0 : index
    %3 = vector.load %arg5[%c0_7, %c0_8] : memref<64x32xf32, #tpu.memory_space<vmem>>, vector<64x32xf32>
    %cst = arith.constant dense<0.000000e+00> : vector<8x64xf32>
    %4 = tpu.matmul %1, %3, %cst {dimension_numbers = #tpu.dot_dimension_numbers<[1], [1], [0], [0], [0, 0, 1, 0], [], []>} : vector<8x32xf32>, vector<64x32xf32>, vector<8x64xf32> -> vector<8x64xf32>
    %5 = vector.extract_strided_slice %4 {offsets = [0, 0], sizes = [8, 32], strides = [1, 1]} : vector<8x64xf32> to vector<8x32xf32>
    %6 = vector.shape_cast %5 : vector<8x32xf32> to vector<2x4x32xf32>
    %7 = vector.extract_strided_slice %4 {offsets = [0, 32], sizes = [8, 32], strides = [1, 1]} : vector<8x64xf32> to vector<8x32xf32>
    %8 = vector.shape_cast %7 : vector<8x32xf32> to vector<2x4x32xf32>
    %9 = tpu.concatenate %6, %8 in 1 : vector<2x4x32xf32>, vector<2x4x32xf32> -> vector<2x8x32xf32>
    %10 = vector.shape_cast %1 : vector<8x32xf32> to vector<2x4x32xf32>
    %c0_9 = arith.constant 0 : index
    %c0_10 = arith.constant 0 : index
    %11 = vector.load %arg6[%c0_9, %c0_10] : memref<2x32xf32, #tpu.memory_space<vmem>>, vector<2x32xf32>
    %12 = vector.extract_strided_slice %11 {offsets = [0, 0], sizes = [1, 32], strides = [1, 1]} : vector<2x32xf32> to vector<1x32xf32>
    %13 = vector.shape_cast %12 : vector<1x32xf32> to vector<32xf32>
    %14 = vector.shape_cast %13 : vector<32xf32> to vector<1x1x32xf32>
    %15 = vector.broadcast %14 : vector<1x1x32xf32> to vector<2x4x32xf32>
    %16 = arith.mulf %10, %15 : vector<2x4x32xf32>
    %cst_11 = arith.constant dense<0.000000e+00> : vector<2x4xf32>
    %17 = vector.multi_reduction <add>, %16, %cst_11 [2] : vector<2x4x32xf32> to vector<2x4xf32>
    %18 = vector.shape_cast %17 : vector<2x4xf32> to vector<2x4x1xf32>
    %19 = vector.extract_strided_slice %11 {offsets = [1, 0], sizes = [1, 32], strides = [1, 1]} : vector<2x32xf32> to vector<1x32xf32>
    %20 = vector.shape_cast %19 : vector<1x32xf32> to vector<32xf32>
    %21 = vector.shape_cast %20 : vector<32xf32> to vector<1x1x32xf32>
    %22 = vector.broadcast %21 : vector<1x1x32xf32> to vector<2x4x32xf32>
    %23 = arith.mulf %10, %22 : vector<2x4x32xf32>
    %cst_12 = arith.constant dense<0.000000e+00> : vector<2x4xf32>
    %24 = vector.multi_reduction <add>, %23, %cst_12 [2] : vector<2x4x32xf32> to vector<2x4xf32>
    %25 = vector.shape_cast %24 : vector<2x4xf32> to vector<2x4x1xf32>
    %26 = tpu.concatenate %18, %25 in 1 : vector<2x4x1xf32>, vector<2x4x1xf32> -> vector<2x8x1xf32>
    "tpu.trace_start"() <{level = 10 : i32, message = "bsh,blh->bsl"}> : () -> ()
    %cst_13 = arith.constant dense<0.000000e+00> : vector<2x8x16xf32>
    %27 = tpu.matmul %9, %0, %cst_13 {dimension_numbers = #tpu.dot_dimension_numbers<[2], [2], [1], [1], [0, 0, 0, 1, 1, 1], [0], [0]>} : vector<2x8x32xf32>, vector<2x16x32xf32>, vector<2x8x16xf32> -> vector<2x8x16xf32>
    "tpu.trace_stop"() : () -> ()
    %28 = vector.broadcast %26 : vector<2x8x1xf32> to vector<2x8x16xf32>
    %29 = arith.addf %27, %28 : vector<2x8x16xf32>
    %cst_14 = arith.constant 0.176776692 : f32
    %30 = vector.broadcast %cst_14 : f32 to vector<2x8x16xf32>
    %31 = arith.mulf %29, %30 : vector<2x8x16xf32>
    %32 = vector.broadcast %2 : vector<2x1x16xf32> to vector<2x8x16xf32>
    %33 = arith.addf %31, %32 : vector<2x8x16xf32>
    %cst_15 = arith.constant dense<0xFF800000> : vector<2x8xf32>
    %34 = vector.multi_reduction <maximumf>, %33, %cst_15 [2] : vector<2x8x16xf32> to vector<2x8xf32>
    %35 = vector.shape_cast %34 : vector<2x8xf32> to vector<2x8x1xf32>
    %36 = vector.broadcast %35 : vector<2x8x1xf32> to vector<2x8x16xf32>
    %37 = arith.subf %33, %36 : vector<2x8x16xf32>
    %38 = math.exp %37 : vector<2x8x16xf32>
    %cst_16 = arith.constant dense<0.000000e+00> : vector<2x8xf32>
    %39 = vector.multi_reduction <add>, %38, %cst_16 [2] : vector<2x8x16xf32> to vector<2x8xf32>
    %40 = vector.shape_cast %39 : vector<2x8xf32> to vector<2x8x1xf32>
    %41 = tpu.reciprocal %40 {approx = true} : vector<2x8x1xf32> -> vector<2x8x1xf32>
    %42 = vector.broadcast %41 : vector<2x8x1xf32> to vector<2x8x16xf32>
    %43 = arith.mulf %38, %42 : vector<2x8x16xf32>
    %c0_17 = arith.constant 0 : index
    %c0_18 = arith.constant 0 : index
    %c0_19 = arith.constant 0 : index
    %44 = vector.load %arg10[%c0_17, %c0_18, %c0_19] : memref<2x8x16xf32, #tpu.memory_space<vmem>>, vector<2x8x16xf32>
    tpu.vector_store %arg10[%c0_17, %c0_18, %c0_19], %43 {strides = array<i32>} : memref<2x8x16xf32, #tpu.memory_space<vmem>>, vector<2x8x16xf32>,
    %c0_20 = arith.constant 0 : index
    %c0_21 = arith.constant 0 : index
    %c0_22 = arith.constant 0 : index
    %45 = vector.load %arg4[%c0_20, %c0_21, %c0_22] : memref<2x4x32xf32, #tpu.memory_space<vmem>>, vector<2x4x32xf32>
    %46 = tpu.transpose %45, [1, 0, 2] : vector<2x4x32xf32> -> vector<4x2x32xf32>
    %c0_23 = arith.constant 0 : index
    %c0_24 = arith.constant 0 : index
    %c0_25 = arith.constant 0 : index
    %47 = vector.load %arg7[%c0_23, %c0_24, %c0_25] : memref<4x32x8xf32, #tpu.memory_space<vmem>>, vector<4x32x8xf32>
    "tpu.trace_start"() <{level = 10 : i32, message = "sbh,shv->sbv"}> : () -> ()
    %cst_26 = arith.constant dense<0.000000e+00> : vector<4x2x8xf32>
    %48 = tpu.matmul %46, %47, %cst_26 {dimension_numbers = #tpu.dot_dimension_numbers<[2], [1], [1], [2], [0, 0, 0, 1, 1, 2], [0], [0]>} : vector<4x2x32xf32>, vector<4x32x8xf32>, vector<4x2x8xf32> -> vector<4x2x8xf32>
    "tpu.trace_stop"() : () -> ()
    %c0_27 = arith.constant 0 : index
    %c0_28 = arith.constant 0 : index
    %c0_29 = arith.constant 0 : index
    %49 = vector.load %arg8[%c0_27, %c0_28, %c0_29] : memref<4x1x8xf32, #tpu.memory_space<vmem>>, vector<4x1x8xf32>
    %50 = vector.broadcast %49 : vector<4x1x8xf32> to vector<4x2x8xf32>
    %51 = arith.addf %48, %50 : vector<4x2x8xf32>
    %cst_30 = arith.constant dense<0xFF800000> : vector<4x2xf32>
    %52 = vector.multi_reduction <maximumf>, %51, %cst_30 [2] : vector<4x2x8xf32> to vector<4x2xf32>
    %53 = vector.shape_cast %52 : vector<4x2xf32> to vector<4x2x1xf32>
    %54 = vector.broadcast %53 : vector<4x2x1xf32> to vector<4x2x8xf32>
    %55 = arith.subf %51, %54 : vector<4x2x8xf32>
    %56 = math.exp %55 : vector<4x2x8xf32>
    %cst_31 = arith.constant dense<0.000000e+00> : vector<4x2xf32>
    %57 = vector.multi_reduction <add>, %56, %cst_31 [2] : vector<4x2x8xf32> to vector<4x2xf32>
    %58 = vector.shape_cast %57 : vector<4x2xf32> to vector<4x2x1xf32>
    %59 = tpu.reciprocal %58 {approx = true} : vector<4x2x1xf32> -> vector<4x2x1xf32>
    %60 = vector.broadcast %59 : vector<4x2x1xf32> to vector<4x2x8xf32>
    %61 = arith.mulf %56, %60 : vector<4x2x8xf32>
    %c0_32 = arith.constant 0 : index
    %c0_33 = arith.constant 0 : index
    %c0_34 = arith.constant 0 : index
    %62 = vector.load %arg9[%c0_32, %c0_33, %c0_34] : memref<4x1x1xf32, #tpu.memory_space<vmem>>, vector<4x1x1xf32>
    %63 = vector.broadcast %62 : vector<4x1x1xf32> to vector<4x2x8xf32>
    %64 = arith.mulf %61, %63 : vector<4x2x8xf32>
    %65 = tpu.transpose %64, [1, 0, 2] : vector<4x2x8xf32> -> vector<2x4x8xf32>
    %c0_35 = arith.constant 0 : index
    %c0_36 = arith.constant 0 : index
    %c0_37 = arith.constant 0 : index
    %66 = vector.load %arg11[%c0_35, %c0_36, %c0_37] : memref<2x4x8xf32, #tpu.memory_space<vmem>>, vector<2x4x8xf32>
    tpu.vector_store %arg11[%c0_35, %c0_36, %c0_37], %65 {strides = array<i32>} : memref<2x4x8xf32, #tpu.memory_space<vmem>>, vector<2x4x8xf32>,
    return
  }
  func.func @transform_0(%arg0: i32) -> (i32, i32, i32) {
    %c0_i32 = arith.constant 0 : i32
    %c0_i32_0 = arith.constant 0 : i32
    %c0_i32_1 = arith.constant 0 : i32
    return %arg0, %c0_i32, %c0_i32_0 : i32, i32, i32
  }
  func.func @transform_1(%arg0: i32) -> (i32, i32) {
    %c0_i32 = arith.constant 0 : i32
    %c0_i32_0 = arith.constant 0 : i32
    return %arg0, %c0_i32 : i32, i32
  }
  func.func @transform_2(%arg0: i32) -> (i32, i32, i32) {
    %c0_i32 = arith.constant 0 : i32
    %c0_i32_0 = arith.constant 0 : i32
    %c0_i32_1 = arith.constant 0 : i32
    return %arg0, %c0_i32, %c0_i32_0 : i32, i32, i32
  }
  func.func @transform_3(%arg0: i32) -> (i32, i32, i32) {
    %c0_i32 = arith.constant 0 : i32
    %c0_i32_0 = arith.constant 0 : i32
    %c0_i32_1 = arith.constant 0 : i32
    return %arg0, %c0_i32, %c0_i32_0 : i32, i32, i32
  }
  func.func @transform_4(%arg0: i32) -> (i32, i32) {
    %c0_i32 = arith.constant 0 : i32
    %c0_i32_0 = arith.constant 0 : i32
    %c0_i32_1 = arith.constant 0 : i32
    return %c0_i32, %c0_i32_0 : i32, i32
  }
  func.func @transform_5(%arg0: i32) -> (i32, i32) {
    %c0_i32 = arith.constant 0 : i32
    %c0_i32_0 = arith.constant 0 : i32
    %c0_i32_1 = arith.constant 0 : i32
    return %c0_i32, %c0_i32_0 : i32, i32
  }
  func.func @transform_6(%arg0: i32) -> (i32, i32, i32) {
    %c0_i32 = arith.constant 0 : i32
    %c0_i32_0 = arith.constant 0 : i32
    %c0_i32_1 = arith.constant 0 : i32
    %c0_i32_2 = arith.constant 0 : i32
    return %c0_i32, %c0_i32_0, %c0_i32_1 : i32, i32, i32
  }
  func.func @transform_7(%arg0: i32) -> (i32, i32, i32) {
    %c0_i32 = arith.constant 0 : i32
    %c0_i32_0 = arith.constant 0 : i32
    %c0_i32_1 = arith.constant 0 : i32
    %c0_i32_2 = arith.constant 0 : i32
    return %c0_i32, %c0_i32_0, %c0_i32_1 : i32, i32, i32
  }
  func.func @transform_8(%arg0: i32) -> (i32, i32, i32) {
    %c0_i32 = arith.constant 0 : i32
    %c0_i32_0 = arith.constant 0 : i32
    %c0_i32_1 = arith.constant 0 : i32
    %c0_i32_2 = arith.constant 0 : i32
    return %c0_i32, %c0_i32_0, %c0_i32_1 : i32, i32, i32
  }
  func.func @transform_9(%arg0: i32) -> (i32, i32, i32) {
    %c0_i32 = arith.constant 0 : i32
    %c0_i32_0 = arith.constant 0 : i32
    %c0_i32_1 = arith.constant 0 : i32
    return %arg0, %c0_i32, %c0_i32_0 : i32, i32, i32
  }
  func.func @transform_10(%arg0: i32) -> (i32, i32, i32) {
    %c0_i32 = arith.constant 0 : i32
    %c0_i32_0 = arith.constant 0 : i32
    %c0_i32_1 = arith.constant 0 : i32
    return %arg0, %c0_i32, %c0_i32_0 : i32, i32, i32
  }
}

</mosaic_0001>

<bundles_post_ra>
// kernel: tpu_custom_call.1
= control target key start
LH: loop header
LB: loop body
LE: loop exit
PB: predicated region body
PF: predicated region fallthrough
CT: control target
= control target key end

     0   :  { %s2297_s0 = inlined_call_operand.vmem [shape: f32[4,16,32], index: 0, kind: input, shape index: {}]   ;;  %s2298_s1 = inlined_call_operand.vmem [shape: f32[16,32], index: 1, kind: input, shape index: {}]   ;;  %s2299_s2 = inlined_call_operand.vmem [shape: f32[4,1,16], index: 2, kind: input, shape index: {}]   ;;  %s2300_s3 = inlined_call_operand.vmem [shape: f32[4,4,32], index: 3, kind: input, shape index: {}]   ;;  %s2301_s4 = inlined_call_operand.vmem [shape: f32[64,32], index: 4, kind: input, shape index: {}]   ;;  %s2302_s5 = inlined_call_operand.vmem [shape: f32[2,32], index: 5, kind: input, shape index: {}]   ;;  %s2303_s6 = inlined_call_operand.vmem [shape: f32[4,32,8], index: 6, kind: input, shape index: {}]   ;;  %s2304_s7 = inlined_call_operand.vmem [shape: f32[4,1,8], index: 7, kind: input, shape index: {}]   ;;  %s2305_s8 = inlined_call_operand.vmem [shape: f32[4,1,1], index: 8, kind: input, shape index: {}]   ;;  %s2306_s9 = inlined_call_operand.hbm [shape: f32[4,8,16], index: 9, kind: output, shape index: {0}]   ;;  %s2307_s10 = inlined_call_operand.hbm [shape: f32[4,4,8], index: 10, kind: output, shape index: {1}]  }
   0x1   :  { %2308 = sst [smem:[#allocation9_spill]] %s2301_s4 }
   0x2   :  { %16 = vsyncpa [#allocation3], 0 }
   0x3   :  { %18 = vsyncpa [#allocation3 + $0x1], 0 }
   0x4   :  { %19 = vsyncpa [#allocation5], 0 }
   0x5   :  { %21 = vsyncpa [#allocation5 + $0x1], 0  ;;  %s1917_s13 = smov 0   ;;  %s1919_s14 = smov 0  }
   0x6   :  { %s1921_s15 = smov 0   ;;  %s1923_s16 = smov 0  }
   0x7 LB: > { %s1938_s17 = sadd.s32 4294967295, %s1847_s16   ;;  %s1455_s18 = sadd.s32 4294967294, %s1847_s16   ;;  %s1847_s16 = sphi %s1923_s16, %s2319_s16   ;;  %s1843_s15 = sphi %s1921_s15, %s2318_s15   ;;  %s1839_s14 = sphi %s1919_s14, %s2317_s14   ;;  %s1835_s13 = sphi %s1917_s13, %s2316_s13  }
   0x8   : > { %s1942_s19 = sadd.s32 1, %s1847_s16   ;;  %s243_s20 = sadd.s32 1, %s1843_s15 }
   0x9   : > { %s240_s21 = ssub.s32 %s1847_s16, %s1942_s19  ;;  %p253_p0 = scmp.ne.s32.totalorder %s1843_s15, %s1839_s14 }
   0xa   : > { %p241_p1 = scmp.eq.s32.totalorder %s240_s21, 0  ;;  %p254_p2 = scmp.eq.s32.totalorder %s1938_s17, 1 }
   0xb   : > { %p259_p3 = scmp.ne.s32.totalorder %s1839_s14, %s1835_s13  ;;  %p260_p4 = scmp.eq.s32.totalorder %s1455_s18, 1 }
   0xc   : > { %s1953_s22 = scalar_select %p241_p1, %s1843_s15, %s243_s20  }
   0xd   : > { %p1955_p5 = por %p254_p2, %p253_p0  ;;  %p1959_p6 = por %p260_p4, %p259_p3 }
   0xe   : > { %2309 = sst [smem:[#allocation8_spill]] %s1953_s22  ;;  %p1458_p7 = scmp.ge.s32.totalorder %s1847_s16, 1 }
   0xf   : > { %p353_p8 = scmp.lt.s32.totalorder %s1847_s16, 3 }
  0x11   : > { %p354_p9 = pnand %p1458_p7, %p353_p8 }
  0x12   : > { %s2312_s4 = sld [smem:[#allocation9_spill]] (!%p354_p9)  ;;  %vm449_vm0 = vcmask (!%p354_p9), 261120   ;;  %v1849_v2 = vmov (!%p354_p9), 0.0|0.0   ;;  %vm1850_vm2 = vmmov (!%p354_p9), 0   ;;  %v1851_v5 = vmov (!%p354_p9), 0.0   ;;  %s1461_s26 = sshll.u32 (!%p354_p9), %s1938_s17, 1 }
  0x13   : > { %357 = sbr.rel (%p354_p9) target bundleno = 1040 (0x410), region = 56  ;;  %1623 = vmatprep.subr.bf16.mxu0 (!%p354_p9), %v1849_v2  ;;  %vm1974_vm1 = vmpackc.low (!%p354_p9), %vm449_vm0, %vm449_vm0  ;;  %1639 = vmatprep.subr.bf16.mxu1 (!%p354_p9), %v1849_v2  ;;  %p411_p10 = scmp.lt.s32.totalorder (!%p354_p9), %s1461_s26, 3  ;;  %v564_v15 = vlaneseq (!%p354_p9)  ;;  %v1852_v16 = vmov (!%p354_p9), 1934713408   ;;  %v848_v18 = vld [vmem:[%s2303_s6 + $0x40] sm:$0xff] (!%p354_p9)  ;;  %v849_v19 = vld [vmem:[%s2303_s6 + $0x48] sm:$0xff] (!%p354_p9) }
  0x14   : > { %1562 = vmatprep.mubr.msk.f32.mxu0 (!%p354_p9), %vm1850_vm2, %v1851_v5  ;;  %1569 = vmatprep.mubr.msk.f32.mxu1 (!%p354_p9), %vm1850_vm2, %v1851_v5  ;;  %p417_p11 = scmp.lt.s32.totalorder (!%p354_p9), %s1938_s17, 1  ;;  %v825_v17 = vunpack.c.l.s4 (!%p354_p9), %v1852_v16  ;;  %v1660_v24 = vpack.c.bf16 (!%p354_p9), %v849_v19, %v848_v18  ;;  %v850_v26 = vld [vmem:[%s2303_s6 + $0x50] sm:$0xff] (!%p354_p9)  ;;  %v851_v27 = vld [vmem:[%s2303_s6 + $0x58] sm:$0xff] (!%p354_p9)  ;;  %v563_v32 = vld [vmem:[%s2302_s5] sm:$0x3] (!%p354_p9)  ;;  %vm570_vm3 = vcmask (!%p354_p9), 257024  }
  0x15   : > { %v2031_v20 = vshrl.u32 (!%p354_p9), %v564_v15, 7  ;;  %v1663_v30 = vpack.c.bf16 (!%p354_p9), %v851_v27, %v850_v26  ;;  %s1853_s30 = smov (!%p354_p9), 96   ;;  %v1854_v53 = vmov (!%p354_p9), 0   ;;  %v1490_v54 = vld [vmem:[%s2304_s7 + $0x2] ss:$0 sm:$0xff] (!%p354_p9)  ;;  %vm1176_vm4 = vcmask (!%p354_p9), 58368  }
  0x16   : > { %v826_v22 = vunpack.c.0.s8 (!%p354_p9), %v825_v17  ;;  %1726 = vset.pattern.permute.xlu1 (!%p354_p9), %v1854_v53  ;;  %1727 = vset.pattern.permute.xlu0 (!%p354_p9), %v1854_v53  ;;  %vm558_vm5 = vcmask (!%p354_p9), 1043456   ;;  %v842_v4 = vld [vmem:[%s2303_s6 + $0x10] sm:$0xff] (!%p354_p9)  ;;  %v847_v16 = vld [vmem:[%s2303_s6 + $0x38] sm:$0xff] (!%p354_p9)  ;;  %v852_v18 = vld [vmem:[%s2303_s6 + $0x60] sm:$0xff] (!%p354_p9)  ;;  %vm781_vm6 = vcmask (!%p354_p9), 130048   ;;  %s2203_s21 = sand.u32 (!%p354_p9), 1, %s1839_s14  }
  0x17   : > { %v579_v33 = vsub.s32 (!%p354_p9), 1, %v2031_v20  ;;  %v566_v34 = vsub.s32 (!%p354_p9), 0, %v2031_v20  ;;  %v846_v15 = vld [vmem:[%s2303_s6 + $0x30] sm:$0xff] (!%p354_p9)  ;;  %v853_v19 = vld [vmem:[%s2303_s6 + $0x68] sm:$0xff] (!%p354_p9)  ;;  %s1855_s20 = smov (!%p354_p9), [#allocation2]  }
  0x18   : > { %v441_v0 = vld [vmem:[%s2312_s4] sm:$0xff] (!%p354_p9)  ;;  %v442_v1 = vld [vmem:[%s2312_s4 + $0x8] sm:$0xff] (!%p354_p9)  ;;  %v443_v6 = vld [vmem:[%s2312_s4 + $0x10] sm:$0xff] (!%p354_p9)  ;;  %v2047_v29 = vsub.s32 (!%p354_p9), %v826_v22, %v2031_v20  ;;  %v1657_v17 = vpack.c.bf16 (!%p354_p9), %v847_v16, %v846_v15  ;;  %v1666_v22 = vpack.c.bf16 (!%p354_p9), %v853_v19, %v852_v18 }
  0x19   : > { %v1624_v3 = vpack.c.bf16 (!%p354_p9), %v442_v1, %v441_v0  ;;  %v444_v7 = vld [vmem:[%s2312_s4 + $0x18] sm:$0xff] (!%p354_p9)  ;;  %v445_v9 = vld [vmem:[%s2312_s4 + $0x20] sm:$0xff] (!%p354_p9)  ;;  %v446_v10 = vld [vmem:[%s2312_s4 + $0x28] sm:$0xff] (!%p354_p9)  ;;  %v580_v35 = vrot.slane (!%p354_p9), %v563_v32, %v579_v33  ;;  %v567_v36 = vrot.slane (!%p354_p9), %v563_v32, %v566_v34 }
  0x1a   : > { %v1628_v8 = vpack.c.bf16 %v444_v7, %v443_v6  ;;  %v1632_v11 = vpack.c.bf16 %v446_v10, %v445_v9  ;;  %v447_v12 = vld [vmem:[%s2312_s4 + $0x30] sm:$0xff]  ;;  %v448_v13 = vld [vmem:[%s2312_s4 + $0x38] sm:$0xff]  ;;  %s2321_s26 = smov (!%p411_p10, %s1461_s26), 3  ;;  %v840_v0 = vld [vmem:[%s2303_s6] sm:$0xff]  ;;  %s1757_s4 = sshll.u32 %s1855_s20, 4  ;;  %s1758_s4 = int_to_ptr.vmem [resolvable:$false] %s1757_s4 }
  0x1b   : > { %1626 = vmatpush3.bf16.xpose.msk.msra.mxu0 %vm1974_vm1, %v1624_v3  ;;  %s418_s11 = scalar_select %p417_p11, %s1938_s17, 1  ;;  %v1636_v14 = vpack.c.bf16 %v448_v13, %v447_v12  ;;  %v841_v1 = vld [vmem:[%s2303_s6 + $0x8] sm:$0xff]  ;;  %v843_v7 = vld [vmem:[%s2303_s6 + $0x18] sm:$0xff] }
  0x1c   : > { %1627 = vmatprep.subr.bf16.mxu0 %v1849_v2  ;;  %s1467_s12 = sshll.u32 %s2321_s26, 2  ;;  %v1648_v6 = vpack.c.bf16 %v841_v1, %v840_v0  ;;  %v1651_v10 = vpack.c.bf16 %v843_v7, %v842_v4  ;;  %v845_v12 = vld [vmem:[%s2303_s6 + $0x28] sm:$0xff]  ;;  %s424_s27 = scalar_lea.vmem %s2299_s2, %s2321_s26 }
  0x1d   : > { %s1464_s18 = sshll.u32 %s418_s11, 3  ;;  %s430_s25 = scalar_lea.vmem %s2300_s3, %s1467_s12  ;;  %v1485_v1 = vld [vmem:[%s424_s27 + $0x1] ss:$0 sm:$0xff] }
  0x1e   : > { %s420_s29 = scalar_lea.vmem %s2298_s1, %s1464_s18  ;;  %v2033_v21 = vld.sshfl [vmem:[%s430_s25] sm:$0x33 pattern:$0x76325410]  ;;  %s1294_s12 = scalar_lea.sflag [#allocation3], %s2203_s21 }
  0x1f   : > { %v438_v23 = vld [vmem:[%s420_s29] sm:$0xff]  ;;  %s1759_s22 = scalar_lea.vmem %s1758_s4, 512 }
  0x20   : > { %v2035_v25 = vld.sshfl [vmem:[%s430_s25 + $0x4] sm:$0x33 pattern:$0x76325410]  ;;  %v581_v37 = vmul.f32 %v580_v35, %v438_v23  ;;  %v568_v38 = vmul.f32 %v567_v36, %v438_v23  ;;  %v561_v41 = vcombine.high %v438_v23, %v438_v23  ;;  %s1508_s25 = sshll.u32 %s2321_s26, 4 }
  0x21   : > { %v823_v28 = vcombine.high %v2033_v21, %v2035_v25  ;;  %s2068_s29 = scalar_lea.vmem %s2297_s0, %s1508_s25  ;;  %v822_v9 = vcombine.low %v2033_v21, %v2035_v25  ;;  %s1459_s25 = sshll.u32 %s2203_s21, 4 }
  0x22   : > { %v583_v39 = vsel %vm570_vm3, %v581_v37, 0.0  ;;  %v571_v40 = vsel %vm570_vm3, %v568_v38, 0.0  ;;  %v582_v42 = vmul.f32 %v580_v35, %v561_v41  ;;  %v569_v43 = vmul.f32 %v567_v36, %v561_v41  ;;  %v434_v44 = vld [vmem:[%s2068_s29] sm:$0xff]  ;;  %v435_v45 = vld [vmem:[%s2068_s29 + $0x8] sm:$0xff]  ;;  %v436_v59 = vld [vmem:[%s2068_s29 + $0x10] sm:$0xff]  ;;  %s402_s28 = scalar_lea.vmem [#allocation2], %s1459_s25 }
  0x23   : > { %1630 = vmatpush3.bf16.xpose.msk.msra.mxu0 %vm1974_vm1, %v1628_v8  ;;  %v2053_v31 = vrot.slane %v823_v28, %v2047_v29  ;;  %584 = vadd.xlane.f32.xlu1 %v583_v39  ;;  %v1640_v46 = vpack.c.bf16 %v435_v45, %v434_v44  ;;  %v437_v60 = vld [vmem:[%s2068_s29 + $0x18] sm:$0xff]  ;;  %v830_v13 = vrot.slane %v822_v9, %v2047_v29  ;;  %v1489_v44 = vld [vmem:[%s2304_s7 + $0x1] ss:$0 sm:$0xff]  ;;  %s1312_s29 = sshll.u32 %s402_s28, 4  ;;  %s2213_s29 = int_to_ptr.vmem [resolvable:$true] %s1312_s29 }
  0x24   : > { %1631 = vmatprep.subr.bf16.mxu0 %v1849_v2  ;;  %v586_v47 = vsel %vm570_vm3, %v582_v42, 0.0  ;;  %v574_v48 = vsel %vm570_vm3, %v569_v43, 0.0  ;;  %v1644_v61 = vpack.c.bf16 %v437_v60, %v436_v59  ;;  %v1484_v60 = vld [vmem:[%s424_s27] ss:$0 sm:$0xff]  ;;  %s1509_s27 = sshll.u32 %s1938_s17, 8  ;;  %s1753_s18 = scalar_lea.vmem %s2213_s29, 256 }
  0x25   : > { %1642 = vmatpush3.bf16.xpose.msk.msra.mxu1 %vm1974_vm1, %v1640_v46  ;;  %v838_v21 = vcombine.high %v830_v13, %v1851_v5  ;;  %v839_v26 = vcombine.high %v2053_v31, %v1851_v5  ;;  %s2211_s11 = scalar_lea.hbm %s2306_s9, %s1509_s27  ;;  %p1754_p12 = scmp.ne.s32.totalorder %s2213_s29, %s1753_s18 }
  0x26   : > { %1643 = vmatprep.subr.bf16.mxu1 %v1849_v2  ;;  %p1760_p1 = scmp.lt.s32.totalorder %s2213_s29, %s1758_s4  ;;  %p1761_p2 = scmp.lt.s32.totalorder %s1759_s22, %s1753_s18 }
  0x27   : > { %587 = vadd.xlane.f32.xlu1 %v586_v47  ;;  %p1755_p13 = pnand %p1754_p12, %p1955_p5 }
  0x28   : > { %p1762_p3 = por %p1761_p2, %p1760_p1 }
  0x29   : > { %p1756_p0 = pneg %p1755_p13 }
  0x2b   : > { %1634 = vmatpush3.bf16.xpose.msk.msra.mxu0 %vm1974_vm1, %v1632_v11  ;;  %575 = vadd.xlane.f32.xlu1 %v574_v48  ;;  %v844_v11 = vld [vmem:[%s2303_s6 + $0x20] sm:$0xff]  ;;  %p1763_p4 = pnand %p1762_p3, %p1756_p0 }
  0x2c   : > { %1635 = vmatprep.subr.bf16.mxu0 %v1849_v2 }
  0x33   : > { %1638 = vmatpush3.bf16.xpose.msk.msra.mxu0 %vm1974_vm1, %v1636_v14  ;;  %v1654_v14 = vpack.c.bf16 %v845_v12, %v844_v11 }
  0x34   : > { %1659 = vmatprep.subr.bf16.mxu0 %v1849_v2 }
  0x3a   : > { %1563 = vmatmul.mubr.msk.f32.vlgmr.msra.gmra.mrb[0].mxu0 %vm449_vm0, %v438_v23  ;;  %v854_v23 = vld [vmem:[%s2303_s6 + $0x70] sm:$0xff] }
  0x3b   : > { %1661 = vmatpush3.bf16.msra.mxu0 %v1660_v24  ;;  %1609 = vmatprep.mubr.msk.f32.mxu0 %vm1850_vm2, %v1851_v5  ;;  %v855_v24 = vld [vmem:[%s2303_s6 + $0x78] sm:$0xff] }
  0x3c   : > { %1662 = vmatprep.subr.bf16.mxu0 %v1849_v2  ;;  %v1669_v25 = vpack.c.bf16 %v855_v24, %v854_v23 }
  0x3f   : > { %1664 = vmatpush3.bf16.msra.mxu0 %v1663_v30 }
  0x42   : > { %1610 = vmatmul.mubr.msk.f32.vlgmr.msra.gmra.mrb[2].mxu0 %vm449_vm0, %v2053_v31  ;;  %v1488_v31 = vld [vmem:[%s2304_s7] ss:$0 sm:$0xff] }
  0xb0   : > { %v585_v27 = vpop.xlane.xlu1 %584 }
  0xb1   : > { %v591_v30 = vrot.slane %v585_v27, 4 }
  0xb4   : > { %v588_v28 = vpop.xlane.xlu1 %587 }
  0xb5   : > { %v592_v32 = vrot.slane %v588_v28, 4 }
  0xb8   : > { %v576_v34 = vpop.xlane.xlu1 %575 }
  0xb9   : > { %v596_v36 = vsel %vm558_vm5, %v576_v34, %v592_v32  ;;  %v1498_v34 = vld [vmem:[%s2305_s8 + $0x2] ss:$0 sm:$0xff] }
 0x10d   : > { %v543_v49 = vpop.f32.mrb[0].mxu0 }
 0x10e   : > { %v1564_v50 = vpop.f32.mrb[1].mxu0  ;;  %v550_v51 = vcombine.low %v543_v49, %v543_v49  ;;  %v548_v52 = vcombine.high %v543_v49, %v543_v49 }
 0x110   : > { %552 = vrot.lane.b32.xlu0 %v550_v51, %s1853_s30 }
 0x114   : > { %554 = vrot.lane.b32.xlu0 %v548_v52, %s1853_s30 }
 0x115   : > { %v1099_v55 = vpop.f32.mrb[2].mxu0 }
 0x116   : > { %v2080_v56 = vadd.f32 %v1490_v54, %v1099_v55  ;;  %v1611_v57 = vpop.f32.mrb[3].mxu0  ;;  %v1491_v55 = vld [vmem:[%s2304_s7 + $0x3] ss:$0 sm:$0xff] }
 0x118   : > { %v1183_v58 = vsel %vm1176_vm4, %v2080_v56, -inf }
 0x133   : > { %572 = vadd.xlane.f32.xlu0 %v571_v40 }
 0x137   : > { %1184 = vmax.xlane.f32.xlu0 %v1183_v58 }
 0x182   : > { %v553_v62 = vpop.permute.xlu0 %552 }
 0x183   : > { %v559_v63 = vsel %vm558_vm5, %v543_v49, %v553_v62 }
 0x184   : > { %1570 = vmatmul.mubr.msk.f32.vlgmr.msra.gmra.mrb[0].mxu1 %vm449_vm0, %v559_v63 }
 0x185   : > { %1646 = vmatpush3.bf16.xpose.msk.msra.mxu1 %vm1974_vm1, %v1644_v61  ;;  %1576 = vmatprep.mubr.msk.f32.mxu1 %vm1850_vm2, %v1851_v5 }
 0x186   : > { %1647 = vmatprep.subr.bf16.mxu1 %v1849_v2  ;;  %v555_v3 = vpop.permute.xlu0 %554 }
 0x187   : > { %v560_v8 = vsel %vm558_vm5, %v548_v52, %v555_v3 }
 0x18c   : > { %1577 = vmatmul.mubr.msk.f32.vlgmr.msra.gmra.mrb[2].mxu1 %vm449_vm0, %v560_v8 }
 0x18d   : > { %1649 = vmatpush3.bf16.msra.mxu1 %v1648_v6  ;;  %1587 = vmatprep.mubr.msk.f32.mxu1 %vm1850_vm2, %v1851_v5 }
 0x18e   : > { %1650 = vmatprep.subr.bf16.mxu1 %v1849_v2 }
 0x191   : > { %1652 = vmatpush3.bf16.msra.mxu1 %v1651_v10 }
 0x192   : > { %1653 = vmatprep.subr.bf16.mxu1 %v1849_v2 }
 0x194   : > { %1588 = vmatmul.mubr.msk.f32.vlgmr.msra.gmra.mrb[4].mxu1 %vm449_vm0, %v830_v13 }
 0x195   : > { %1655 = vmatpush3.bf16.msra.mxu1 %v1654_v14  ;;  %1598 = vmatprep.mubr.msk.f32.mxu1 %vm1850_vm2, %v1851_v5 }
 0x196   : > { %1656 = vmatprep.subr.bf16.mxu1 %v1849_v2 }
 0x199   : > { %1658 = vmatpush3.bf16.msra.mxu1 %v1657_v17 }
 0x19a   : > { %1665 = vmatprep.subr.bf16.mxu1 %v1849_v2 }
 0x19c   : > { %1599 = vmatmul.mubr.msk.f32.vlgmr.msra.gmra.mrb[6].mxu1 %vm449_vm0, %v838_v21 }
 0x19d   : > { %1667 = vmatpush3.bf16.msra.mxu1 %v1666_v22  ;;  %1620 = vmatprep.mubr.msk.f32.mxu1 %vm1850_vm2, %v1851_v5 }
 0x19e   : > { %1668 = vmatprep.subr.bf16.mxu1 %v1849_v2 }
 0x1a1   : > { %1670 = vmatpush3.bf16.msra.mxu1 %v1669_v25 }
 0x1a4   : > { %1621 = vmatmul.mubr.msk.f32.vlgmr.msra.gmra.mrb[8].mxu1 %vm449_vm0, %v839_v26 }
 0x1c0   : > { %v573_v33 = vpop.xlane.xlu0 %572 }
 0x1c1   : > { %v595_v35 = vsel %vm558_vm5, %v573_v33, %v591_v30  ;;  %v1497_v33 = vld [vmem:[%s2305_s8 + $0x1] ss:$0 sm:$0xff] }
 0x1c2   : > { %599 = vperm.xlu1 %1726, %v595_v35   ;;  %v1496_v35 = vld [vmem:[%s2305_s8] ss:$0 sm:$0xff] }
 0x1c4   : > { %v1185_v45 = vpop.xlane.xlu0 %1184 }
 0x1c5   : > { %v1191_v50 = vsub.f32 %v2080_v56, %v1185_v45 }
 0x1c6   : > { %604 = vperm.xlu1 %1726, %v596_v36  }
 0x1c7   : > { %v1197_v54 = vmul.f32 1.442695, %v1191_v50 }
 0x1c9   : > { %1729 = vpow2.f32 %v1197_v54 }
 0x1d3   : > { %v2172_v7 = vpop.eup %1729 }
 0x1d4   : > { %v1207_v8 = vsel %vm1176_vm4, %v2172_v7, 0.0 }
 0x241   : > { %v600_v46 = vpop.permute.xlu1 %599 }
 0x245   : > { %v605_v53 = vpop.permute.xlu1 %604 }
 0x257   : > { %v682_v37 = vpop.f32.mrb[0].mxu1 }
 0x258   : > { %v1571_v2 = vpop.f32.mrb[1].mxu1  ;;  %v683_v51 = vadd.f32 %v682_v37, %v600_v46 }
 0x25a   : > { %v765_v57 = vmul.f32 0.17677669, %v683_v51 }
 0x25c   : > { %v779_v0 = vadd.f32 %v1484_v60, %v765_v57 }
 0x25e   : > { %v782_v3 = vsel %vm781_vm6, %v779_v0, -inf }
 0x25f   : > { %v761_v38 = vpop.f32.mrb[2].mxu1 }
 0x260   : > { %v1578_v39 = vpop.f32.mrb[3].mxu1  ;;  %v762_v58 = vadd.f32 %v761_v38, %v605_v53 }
 0x261   : > { %v1499_v39 = vld [vmem:[%s2305_s8 + $0x3] ss:$0 sm:$0xff] }
 0x262   : > { %v766_v62 = vmul.f32 0.17677669, %v762_v58 }
 0x264   : > { %v780_v6 = vadd.f32 %v1485_v1, %v766_v62 }
 0x266   : > { %v785_v4 = vsel %vm781_vm6, %v780_v6, -inf }
 0x267   : > { %v953_v40 = vpop.f32.mrb[4].mxu1 }
 0x268   : > { %v954_v41 = vadd.f32 %v1488_v31, %v953_v40  ;;  %v1589_v42 = vpop.f32.mrb[5].mxu1 }
 0x26a   : > { %v1177_v43 = vsel %vm1176_vm4, %v954_v41, -inf }
 0x26b   : > { %1178 = vmax.xlane.f32.xlu1 %v1177_v43 }
 0x26f   : > { %v1026_v47 = vpop.f32.mrb[6].mxu1 }
 0x270   : > { %v1027_v48 = vadd.f32 %v1489_v44, %v1026_v47  ;;  %v1600_v49 = vpop.f32.mrb[7].mxu1 }
 0x272   : > { %v1180_v52 = vsel %vm1176_vm4, %v1027_v48, -inf }
 0x273   : > { %1181 = vmax.xlane.f32.xlu0 %v1180_v52 }
 0x277   : > { %v1172_v59 = vpop.f32.mrb[8].mxu1 }
 0x278   : > { %v1173_v61 = vadd.f32 %v1491_v55, %v1172_v59  ;;  %v1622_v56 = vpop.f32.mrb[9].mxu1 }
 0x27a   : > { %v1186_v63 = vsel %vm1176_vm4, %v1173_v61, -inf }
 0x27b   : > { %1187 = vmax.xlane.f32.xlu0 %v1186_v63 }
 0x27f   : > { %783 = vmax.xlane.f32.xlu0 %v782_v3 }
 0x283   : > { %786 = vmax.xlane.f32.xlu0 %v785_v4 }
 0x287   : > { %1208 = vadd.xlane.f32.xlu0 %v1207_v8 }
 0x2f8   : > { %v1179_v10 = vpop.xlane.xlu1 %1178 }
 0x2f9   : > { %v1189_v12 = vsub.f32 %v954_v41, %v1179_v10 }
 0x2fb   : > { %v1193_v15 = vmul.f32 1.442695, %v1189_v12 }
 0x300   : > { %v1182_v9 = vpop.xlane.xlu0 %1181 }
 0x301   : > { %v1190_v16 = vsub.f32 %v1027_v48, %v1182_v9 }
 0x303   : > { %v1195_v21 = vmul.f32 1.442695, %v1190_v16 }
 0x308   : > { %v1188_v11 = vpop.xlane.xlu0 %1187 }
 0x309   : > { %v1192_v36 = vsub.f32 %v1173_v61, %v1188_v11 }
 0x30b   : > { %v1199_v37 = vmul.f32 1.442695, %v1192_v36 }
 0x30c   : > { %v784_v13 = vpop.xlane.xlu0 %783 }
 0x30d   : > { %v788_v14 = vsub.f32 %v779_v0, %v784_v13 }
 0x30f   : > { %v790_v17 = vmul.f32 1.442695, %v788_v14 }
 0x310   : > { %v787_v18 = vpop.xlane.xlu0 %786 }
 0x311   : > { %1731 = vpow2.f32 %v790_v17  ;;  %v789_v19 = vsub.f32 %v780_v6, %v787_v18 }
 0x312   : > { %1733 = vpow2.f32 %v1193_v15 }
 0x313   : > { %v792_v22 = vmul.f32 1.442695, %v789_v19 }
 0x314   : > { %v1209_v31 = vpop.xlane.xlu0 %1208 }
 0x315   : > { %1735 = vpow2.f32 %v792_v22 }
 0x316   : > { %1737 = vpow2.f32 %v1195_v21 }
 0x317   : > { %1739 = vpow2.f32 %v1199_v37 }
 0x31b   : > { %v1732_v23 = vpop.eup %1731 }
 0x31c   : > { %v794_v24 = vsel %vm781_vm6, %v1732_v23, 0.0  ;;  %v2177_v25 = vpop.eup %1733 }
 0x31d   : > { %795 = vadd.xlane.f32.xlu0 %v794_v24  ;;  %v1201_v27 = vsel %vm1176_vm4, %v2177_v25, 0.0 }
 0x31f   : > { %v1736_v26 = vpop.eup %1735 }
 0x320   : > { %v797_v28 = vsel %vm781_vm6, %v1736_v26, 0.0  ;;  %v2182_v30 = vpop.eup %1737 }
 0x321   : > { %1202 = vadd.xlane.f32.xlu0 %v1201_v27  ;;  %798 = vadd.xlane.f32.xlu1 %v797_v28  ;;  %v1204_v32 = vsel %vm1176_vm4, %v2182_v30, 0.0  ;;  %v2195_v2 = vpop.eup %1739 }
 0x322   : > { %v1210_v38 = vsel %vm1176_vm4, %v2195_v2, 0.0 }
 0x325   : > { %1205 = vadd.xlane.f32.xlu0 %v1204_v32 }
 0x332   : > { %1250 = vperm.xlu1 %1726, %v1497_v33  }
 0x336   : > { %1254 = vperm.xlu1 %1726, %v1498_v34  }
 0x33b   : > { %1246 = vperm.xlu0 %1727, %v1496_v35  }
 0x35a   : > { %1211 = vadd.xlane.f32.xlu1 %v1210_v38 }
 0x36b   : > { %1258 = vperm.xlu1 %1726, %v1499_v39  }
 0x3aa   : > { %v796_v40 = vpop.xlane.xlu0 %795 }
 0x3ab   : > { %1741 = vrcp.f32 %v796_v40 }
 0x3ae   : > { %v799_v41 = vpop.xlane.xlu1 %798 }
 0x3af   : > { %1743 = vrcp.f32 %v799_v41 }
 0x3b5   : > { %v1742_v42 = vpop.eup %1741 }
 0x3b6   : > { %v802_v43 = vmul.f32 %v1742_v42, %v1732_v23 }
 0x3b8   : > { %804 = vst.msk [vmem:[%s402_s28] sm:$0xff] %vm781_vm6, %v802_v43 }
 0x3b9   : > { %v1744_v44 = vpop.eup %1743 }
 0x3ba   : > { %v803_v45 = vmul.f32 %v1744_v44, %v1736_v26 }
 0x3bc   : > { %805 = vst.msk [vmem:[%s402_s28 + $0x8] sm:$0xff] %vm781_vm6, %v803_v45 }
 0x3bd   : > { %1766 = shalt.err (!%p1763_p4)
}
 0x3be   : > { %s1767_s25 = scalar_lea.hbm %s2211_s11, 256  ;;  %s1771_s26 = scalar_lea.hbm %s2306_s9, 512 }
 0x3bf   : > { %p1768_p7 = scmp.ne.s32.totalorder %s2211_s11, %s1767_s25  ;;  %p1772_p10 = scmp.lt.u32.totalorder %s2211_s11, %s2306_s9 }
 0x3c0   : > { %p1773_p11 = scmp.lt.u32.totalorder %s1771_s26, %s1767_s25  ;;  %p1775_p13 = scmp.lt.u32.totalorder %s1767_s25, %s2211_s11 }
 0x3c1   : > { %p1769_p8 = pnand %p1768_p7, %p1955_p5 }
 0x3c2   : > { %p1774_p12 = por %p1773_p11, %p1772_p10 }
 0x3c3   : > { %p1770_p9 = pneg %p1769_p8 }
 0x3c4   : > { %p1776_p0 = por %p1775_p13, %p1774_p12 }
 0x3c6   : > { %p1777_p1 = pnand %p1776_p0, %p1770_p9 }
 0x3c8   : > { %1780 = shalt.err (!%p1777_p1)
}
 0x3c9   : > { %s1856_s18 = smov 128   ;;  %s1857_s4 = smov 8   ;;  %v1203_v46 = vpop.xlane.xlu0 %1202  ;;  %v1251_v47 = vpop.permute.xlu1 %1250  ;;  %v1858_v54 = vmov 1983009808   ;;  %vm1290_vm7 = vcmask 60416  }
 0x3ca   : > { %1671 = dma.vmem_to_hbm [thread:$0]  (%p1955_p5), %s2213_s29, 256, %s2211_s11, %s1294_s12, %s1856_s18, %s1856_s18, %s1857_s4   ;;  %1745 = vrcp.f32 %v1203_v46  ;;  %v1267_v55 = vunpack.c.l.s4 %v1858_v54 }
 0x3cb   : > { %1747 = vrcp.f32 %v1209_v31  ;;  %s1460_s29 = sshll.u32 %s2203_s21, 3  ;;  %s1510_s11 = sshll.u32 %s1938_s17, 7 }
 0x3cc   : > { %v1268_v60 = vunpack.c.0.s8 %v1267_v55  ;;  %s409_s12 = scalar_lea.vmem [#allocation4], %s1460_s29  ;;  %s2251_s28 = scalar_lea.hbm %s2307_s10, %s1510_s11 }
 0x3cd   : > { %v1206_v48 = vpop.xlane.xlu0 %1205  ;;  %v1255_v49 = vpop.permute.xlu1 %1254  ;;  %s1328_s22 = sshll.u32 %s409_s12, 4  ;;  %s1299_s17 = scalar_lea.sflag [#allocation5], %s2203_s21  ;;  %s2253_s22 = int_to_ptr.vmem [resolvable:$true] %s1328_s22 }
 0x3ce   : > { %1749 = vrcp.f32 %v1206_v48  ;;  %v1271_v3 = vsub.s32 %v1268_v60, %v2031_v20  ;;  %s1781_s26 = scalar_lea.vmem %s2253_s22, 128  ;;  %s1859_s30 = smov [#allocation4]  }
 0x3cf   : > { %p1782_p2 = scmp.ne.s32.totalorder %s2253_s22, %s1781_s26  ;;  %s1785_s20 = sshll.u32 %s1859_s30, 4  ;;  %s1786_s20 = int_to_ptr.vmem [resolvable:$false] %s1785_s20 }
 0x3d0   : > { %s1787_s18 = scalar_lea.vmem %s1786_s20, 256  ;;  %p1788_p7 = scmp.lt.s32.totalorder %s2253_s22, %s1786_s20 }
 0x3d1   : > { %v1247_v58 = vpop.permute.xlu0 %1246  ;;  %p1783_p3 = pnand %p1782_p2, %p1955_p5  ;;  %p1789_p8 = scmp.lt.s32.totalorder %s1787_s18, %s1781_s26 }
 0x3d3   : > { %p1784_p4 = pneg %p1783_p3  ;;  %p1790_p9 = por %p1789_p8, %p1788_p7 }
 0x3d4   : > { %v1746_v51 = vpop.eup %1745 }
 0x3d5   : > { %v1748_v52 = vpop.eup %1747  ;;  %v1217_v53 = vmul.f32 %v1746_v51, %v2177_v25  ;;  %p1791_p10 = pnand %p1790_p9, %p1784_p4 }
 0x3d6   : > { %v1219_v59 = vmul.f32 %v1748_v52, %v2172_v7 }
 0x3d7   : > { %v1261_v61 = vmul.f32 %v1247_v58, %v1217_v53 }
 0x3d8   : > { %v1750_v57 = vpop.eup %1749  ;;  %v1263_v63 = vmul.f32 %v1255_v49, %v1219_v59 }
 0x3d9   : > { %v1218_v56 = vmul.f32 %v1750_v57, %v2182_v30 }
 0x3da   : > { %v1265_v6 = vcombine.low %v1261_v61, %v1263_v63 }
 0x3db   : > { %v1262_v4 = vmul.f32 %v1251_v47, %v1218_v56 }
 0x3dc   : > { %v1272_v10 = vrot.slane %v1265_v6, %v1271_v3 }
 0x3e7   : > { %v1212_v50 = vpop.xlane.xlu1 %1211 }
 0x3e8   : > { %1751 = vrcp.f32 %v1212_v50 }
 0x3eb   : > { %v1259_v1 = vpop.permute.xlu1 %1258 }
 0x3f2   : > { %v1752_v62 = vpop.eup %1751 }
 0x3f3   : > { %v1220_v0 = vmul.f32 %v1752_v62, %v2195_v2 }
 0x3f5   : > { %v1264_v8 = vmul.f32 %v1259_v1, %v1220_v0 }
 0x3f7   : > { %v1273_v9 = vcombine.low %v1262_v4, %v1264_v8 }
 0x3f9   : > { %v1280_v7 = vrot.slane %v1273_v9, %v1271_v3 }
 0x3fb   : > { %v1281_v11 = vcombine.low %v1272_v10, %v1280_v7 }
 0x3fd   : > { %v1288_v12 = vrot.slane %v1281_v11, %v2047_v29 }
 0x3ff   : > { %v1289_v20 = vcombine.high %v1288_v12, %v1851_v5  ;;  %1291 = vst.msk [vmem:[%s409_s12] sm:$0xf] %vm1290_vm7, %v1288_v12 }
 0x401   : > { %1292 = vst.msk [vmem:[%s409_s12 + $0x4] sm:$0xf] %vm1290_vm7, %v1289_v20 }
 0x402   : > { %1794 = shalt.err (!%p1791_p10)
}
 0x403   : > { %s1795_s4 = scalar_lea.hbm %s2251_s28, 128  ;;  %s1799_s12 = scalar_lea.hbm %s2307_s10, 256 }
 0x404   : > { %p1796_p11 = scmp.ne.s32.totalorder %s2251_s28, %s1795_s4  ;;  %p1800_p0 = scmp.lt.u32.totalorder %s2251_s28, %s2307_s10 }
 0x405   : > { %p1801_p1 = scmp.lt.u32.totalorder %s1799_s12, %s1795_s4  ;;  %p1803_p3 = scmp.lt.u32.totalorder %s1795_s4, %s2251_s28 }
 0x406   : > { %p1797_p12 = pnand %p1796_p11, %p1955_p5 }
 0x407   : > { %p1802_p2 = por %p1801_p1, %p1800_p0 }
 0x408   : > { %p1798_p13 = pneg %p1797_p12 }
 0x409   : > { %p1804_p4 = por %p1803_p3, %p1802_p2 }
 0x40b   : > { %p1805_p7 = pnand %p1804_p4, %p1798_p13 }
 0x40d   : > { %1808 = shalt.err (!%p1805_p7)
}
 0x40e   : > { %s1860_s26 = smov 64   ;;  %s1861_s30 = smov 4  }
 0x40f   : > { %1672 = dma.vmem_to_hbm [thread:$0]  (%p1955_p5), %s2253_s22, 128, %s2251_s28, %s1299_s17, %s1860_s26, %s1860_s26, %s1861_s30  }
 0x410 PF: > { %p1682_p8 = scmp.ge.s32.totalorder %s1847_s16, 2  ;;  %s1343_s20 = sand.u32 1, %s1835_s13  }
 0x411   : > { %s1344_s18 = scalar_lea.sflag [#allocation3], %s1343_s20 }
 0x412   : > { %p1676_p9 = pnand %p1682_p8, %p1959_p6 }
 0x414   : > { %1826 = dma.done.wait (!%p1676_p9), %s1344_s18, 256  }
 0x415   : > { %1828 = vsyncadd (!%p1676_p9), %s1344_s18, 4294967040  ;;  %s1353_s4 = scalar_lea.sflag [#allocation5], %s1343_s20 }
 0x416   : > { %1830 = dma.done.wait (!%p1676_p9), %s1353_s4, 128  }
 0x417   : > { %1832 = vsyncadd (!%p1676_p9), %s1353_s4, 4294967168  ;;  %s2315_s23 = sld [smem:[#allocation8_spill]]  ;;  %p24_p5 = scmp.ge.s32.totalorder %s1942_s19, 4  }
 0x418   : > { %s2316_s13 = smov %s1839_s14  ;;  %s2317_s14 = smov %s1843_s15 }
 0x419   : > { %s2319_s16 = smov %s1942_s19  ;;  %26 = sbr.rel (!%p24_p5) target bundleno = 7 (0x7), region = 117 }
 0x41d   : > { %s2318_s15 = smov %s2315_s23 }
 0x420   :  { %1358 = vsyncpa [#allocation3], 1 }
 0x421   :  { %1360 = vsyncpa [#allocation3 + $0x1], 1 }
 0x422   :  { %1361 = vsyncpa [#allocation5], 1 }
 0x423   :  { %1363 = vsyncpa [#allocation5 + $0x1], 1 }

</bundles_post_ra>
